<compile_context>
chip_gen: v7x
topology: tpu7x:2x2x1
jax: 0.10.0
libtpu: 0.0.40
codegen_flags: <defaults>
</compile_context>

<pallas_src>
import jax
import jax.numpy as jnp
import numpy as np
from jax import lax
from jax.experimental import pallas as pl
from jax.experimental.pallas import tpu as pltpu

EPS = 1e-5


def _out_hw(h, w, stride):                                 # k=3, pad=1
    return (h - 1) // stride + 1, (w - 1) // stride + 1


def _vmem_budget_bytes():
    """Generation-aware VMEM budget: ~48 MiB on 64 MiB parts (v7x), ~96 MiB on
    128 MiB parts (v5e/v6e); conservative fallback if the query is unavailable."""
    cap = 64 * 1024 * 1024
    try:
        cap = int(pltpu.get_tpu_info().vmem_capacity_bytes)
    except Exception:
        pass
    return min((cap * 3) // 4, 100 * 1024 * 1024)


def _banded_conv_weights(w_hwio, n_wpad, wo, stride, cin, cout, lane_order,
                         sc_w=None, sc_cout=0):
    """Banded weight matrices for a 3x3 conv executed as 3 row-band matmuls.

    Returns (3, L, wo*cout [+ wo*sc_cout]) with L = n_wpad*cin.  Row index is
    c*n_wpad + wp for lane_order='cw' (CHW-flat slab) or wp*cin + c for 'wc'
    (interleaved slab), with wp = wo*stride + kw the padded column position.
    The optional 1x1 shortcut weight sc_w (cin, sc_cout) is fused into the
    kh=1 band as extra output columns (center tap, wp = wo*stride + 1).
    """
    L = n_wpad * cin
    kw_i, wo_i, c_i, co_i = np.indices((3, wo, cin, cout))
    wp = wo_i * stride + kw_i
    rows = c_i * n_wpad + wp if lane_order == "cw" else wp * cin + c_i
    cols = wo_i * cout + co_i
    mats = []
    for kh in range(3):
        vals = w_hwio[kh][kw_i, c_i, co_i]                 # (3, wo, cin, cout)
        b = jnp.zeros((L, wo * cout), jnp.float32).at[rows, cols].set(vals)
        if sc_cout:
            bs = jnp.zeros((L, wo * sc_cout), jnp.float32)
            if kh == 1:
                wo_j, c_j, co_j = np.indices((wo, cin, sc_cout))
                wp_j = wo_j * stride + 1
                rows_j = (c_j * n_wpad + wp_j if lane_order == "cw"
                          else wp_j * cin + c_j)
                bs = bs.at[rows_j, wo_j * sc_cout + co_j].set(sc_w[c_j, co_j])
            b = jnp.concatenate([b, bs], axis=1)
        mats.append(b)
    return jnp.stack(mats, axis=0)


def _row_stats(a):
    """[sum; sum of squares] over rows of an (M, L) f32 slab -> (2, L)."""
    return jnp.concatenate([jnp.sum(a, axis=0, keepdims=True),
                            jnp.sum(a * a, axis=0, keepdims=True)], axis=0)


def _make_stage1(H, W, Cin, Cmid, Csc, stride, TN, mm_dtype, slab_dtype):
    Ho, Wo = _out_hw(H, W, stride)
    Wp = W + 2
    Lx = Wp * Cin
    n1 = Wo * Cmid

    def kernel(x_ref, bw_ref, a1_ref, sc_ref, st1_ref, sts_ref, xpad):
        # Zero the padded slab every step (safe under "parallel" semantics),
        # then scatter the NCHW block into the lane-dense CHW-flat layout:
        #   xpad[n, h+1, c*(W+2) + w + 1] = x[n, c, h, w]
        xpad[...] = jnp.zeros_like(xpad)
        x = x_ref[...]                                      # (TN, Cin, H, W) f32
        for c in range(Cin):
            xpad[:, 1:H + 1, c * Wp + 1:c * Wp + 1 + W] = x[:, c]

        xp = xpad[...]
        acc = None                                          # conv1 + fused shortcut
        for kh in range(3):
            rows = xp[:, kh:kh + stride * (Ho - 1) + 1:stride, :]
            t = jnp.dot(rows.reshape(TN * Ho, Lx).astype(mm_dtype), bw_ref[kh],
                        preferred_element_type=jnp.float32)
            acc = t if acc is None else acc + t

        a1 = acc[:, :n1]                                    # raw conv1 output
        sc = acc[:, n1:]                                    # raw shortcut output
        st1_ref[...] = _row_stats(a1).reshape(1, 2, n1)     # per-step BN1 stats
        sts_ref[...] = _row_stats(sc).reshape(1, 2, Wo * Csc)
        a1_ref[...] = a1.astype(slab_dtype)
        sc_ref[...] = sc.astype(slab_dtype)

    return kernel


def _make_stage2(Ho, Wo, Cmid, Cout, TN, mm_dtype, slab_dtype):
    Wp = Wo + 2
    L = Wp * Cmid

    def kernel(a1_ref, s1_ref, b1_ref, bw_ref, a2_ref, st2_ref, apad):
        apad[...] = jnp.zeros_like(apad)
        # BN1 (folded scale/shift, lane-dense FMA) + ReLU, straight into the
        # padded slab: apad[n, ho+1, (wo+1)*Cmid + c] = relu(a1*s1+b1)
        a1 = a1_ref[...].astype(jnp.float32)
        a1n = jnp.maximum(a1 * s1_ref[...] + b1_ref[...], 0.0)
        apad[:, 1:Ho + 1, Cmid:(Wo + 1) * Cmid] = a1n.reshape(TN, Ho, Wo * Cmid)

        ap = apad[...]
        acc = None                                          # conv2 (3x3, stride 1)
        for kh in range(3):
            t = jnp.dot(ap[:, kh:kh + Ho, :].reshape(TN * Ho, L).astype(mm_dtype),
                        bw_ref[kh], preferred_element_type=jnp.float32)
            acc = t if acc is None else acc + t

        st2_ref[...] = _row_stats(acc).reshape(1, 2, Wo * Cout)
        a2_ref[...] = acc.astype(slab_dtype)

    return kernel


def _stage3_kernel(a2_ref, sc_ref, s2_ref, b2_ref, ss_ref, bs_ref, o_ref):
    # BN2 + shortcut BN (both folded into lane-dense scale/shift) + residual + ReLU
    a2 = a2_ref[...].astype(jnp.float32)
    sc = sc_ref[...].astype(jnp.float32)
    o_ref[...] = jnp.maximum(a2 * s2_ref[...] + b2_ref[...]
                             + sc * ss_ref[...] + bs_ref[...], 0.0)


def _bn_fold(stats, gamma, beta, count, wo, c):
    """stats: (2, wo*c) lane-layout [sum; sumsq] -> per-channel (scale, shift)."""
    s = stats.reshape(2, wo, c).sum(axis=1)
    mean = s[0] / count
    var = jnp.maximum(s[1] / count - mean * mean, 0.0)      # clamp f32 cancellation
    scale = gamma.reshape(-1) * lax.rsqrt(var + EPS)
    shift = beta.reshape(-1) - mean * scale
    return scale, shift


def _lane_tile(v, wo):
    """(C,) per-channel vector -> (1, wo*C) lane-dense row (index wo*C + c)."""
    return jnp.tile(v.reshape(1, -1), (1, wo))


def _pick_tn(N, Ho, per_sample_bytes, fixed_bytes, budget):
    valid = [t for t in range(1, N + 1)
             if N % t == 0 and (t == N or (t * Ho) % 8 == 0)]
    fitting = [t for t in valid if fixed_bytes + t * per_sample_bytes <= budget]
    return max(fitting) if fitting else min(valid)


def basic_block_forward(x_nchw, params, stride, empty_shortcut, *,
                        matmul_dtype=jnp.bfloat16):
    """Pallas forward of BasicBlock_customized.  x_nchw: (N, Cin, H, W) f32."""
    N, Cin, H, W = x_nchw.shape
    Cmid = params["w1"].shape[-1]
    Cout = params["w2"].shape[-1]

    if not empty_shortcut:
        kind = "conv"
    elif Cin != Cout:
        kind = "convert"
    else:
        kind = "identity"
    # PyTorch would shape-error on an empty shortcut with stride != 1.
    assert kind == "conv" or stride == 1

    Ho, Wo = _out_hw(H, W, stride)
    M = N * Ho * Wo
    mm_dtype = matmul_dtype
    slab_dtype = jnp.bfloat16 if mm_dtype == jnp.bfloat16 else jnp.float32
    mm_sz = jnp.dtype(mm_dtype).itemsize
    sl_sz = jnp.dtype(slab_dtype).itemsize

    n1 = Wo * Cmid                                          # conv1 lane width
    nsc = Wo * Cout                                         # shortcut / conv2 width
    Lx = (W + 2) * Cin
    L2 = (Wo + 2) * Cmid

    # --- per-generation VMEM budget and batch-tile selection ------------------
    vmem_limit = _vmem_budget_bytes()
    per_sample = max(
        2 * Cin * H * W * 4 + (H + 2) * Lx * 4
        + 2 * Ho * (n1 + nsc) * sl_sz + Ho * (n1 + nsc) * 4,
        2 * Ho * n1 * sl_sz + (Ho + 2) * L2 * 4
        + 2 * Ho * nsc * sl_sz + Ho * nsc * 4,
        4 * Ho * nsc * sl_sz + 2 * Ho * nsc * 4)
    fixed = 2 * (3 * Lx * (n1 + nsc) + 3 * L2 * nsc) * mm_sz + (4 << 20)
    TN = _pick_tn(N, Ho, per_sample, fixed, vmem_limit)
    G = N // TN

    cp = pltpu.CompilerParams(dimension_semantics=("parallel",),
                              vmem_limit_bytes=vmem_limit)

    x = x_nchw.astype(jnp.float32)

    # Banded weights (wrapper-side, tiny): conv1 with the shortcut fused into the
    # kh=1 band; the identity / Convert shortcut is a 0/1 channel matrix (exact
    # in f32 mode; bf16 fast mode rounds the shortcut like every other operand).
    ws_eff = params["ws"] if kind == "conv" else jnp.eye(Cin, Cout, dtype=jnp.float32)
    bw1 = _banded_conv_weights(params["w1"], W + 2, Wo, stride, Cin, Cmid, "cw",
                               sc_w=ws_eff, sc_cout=Cout).astype(mm_dtype)
    bw2 = _banded_conv_weights(params["w2"], Wo + 2, Wo, 1, Cmid, Cout,
                               "wc").astype(mm_dtype)

    # ---- stage 1: conv1 + fused shortcut (one banded matmul per kh) ----------
    k1 = _make_stage1(H, W, Cin, Cmid, Cout, stride, TN, mm_dtype, slab_dtype)
    a1_raw, sc_raw, st1, st_s = pl.pallas_call(
        k1, grid=(G,),
        in_specs=[pl.BlockSpec((TN, Cin, H, W), lambda i: (i, 0, 0, 0)),
                  pl.BlockSpec((3, Lx, n1 + nsc), lambda i: (0, 0, 0))],
        out_specs=[pl.BlockSpec((TN * Ho, n1), lambda i: (i, 0)),
                   pl.BlockSpec((TN * Ho, nsc), lambda i: (i, 0)),
                   pl.BlockSpec((1, 2, n1), lambda i: (i, 0, 0)),
                   pl.BlockSpec((1, 2, nsc), lambda i: (i, 0, 0))],
        out_shape=[jax.ShapeDtypeStruct((N * Ho, n1), slab_dtype),
                   jax.ShapeDtypeStruct((N * Ho, nsc), slab_dtype),
                   jax.ShapeDtypeStruct((G, 2, n1), jnp.float32),
                   jax.ShapeDtypeStruct((G, 2, nsc), jnp.float32)],
        scratch_shapes=[pltpu.VMEM((TN, H + 2, Lx), jnp.float32)],
        compiler_params=cp,
    )(x, bw1)

    s1v, b1v = _bn_fold(st1.sum(axis=0), params["g1"], params["b1"], M, Wo, Cmid)

    # ---- stage 2: BN1 + ReLU, conv2 -------------------------------------------
    k2 = _make_stage2(Ho, Wo, Cmid, Cout, TN, mm_dtype, slab_dtype)
    a2_raw, st2 = pl.pallas_call(
        k2, grid=(G,),
        in_specs=[pl.BlockSpec((TN * Ho, n1), lambda i: (i, 0)),
                  pl.BlockSpec((1, n1), lambda i: (0, 0)),
                  pl.BlockSpec((1, n1), lambda i: (0, 0)),
                  pl.BlockSpec((3, L2, nsc), lambda i: (0, 0, 0))],
        out_specs=[pl.BlockSpec((TN * Ho, nsc), lambda i: (i, 0)),
                   pl.BlockSpec((1, 2, nsc), lambda i: (i, 0, 0))],
        out_shape=[jax.ShapeDtypeStruct((N * Ho, nsc), slab_dtype),
                   jax.ShapeDtypeStruct((G, 2, nsc), jnp.float32)],
        scratch_shapes=[pltpu.VMEM((TN, Ho + 2, L2), jnp.float32)],
        compiler_params=cp,
    )(a1_raw, _lane_tile(s1v, Wo), _lane_tile(b1v, Wo), bw2)

    s2v, b2v = _bn_fold(st2.sum(axis=0), params["g2"], params["b2"], M, Wo, Cout)
    if kind == "conv":
        ssv, bsv = _bn_fold(st_s.sum(axis=0), params["gs"], params["bs"], M, Wo, Cout)
    else:                                                   # identity / Convert: no BN
        ssv = jnp.ones((Cout,), jnp.float32)
        bsv = jnp.zeros((Cout,), jnp.float32)

    # ---- stage 3: BN2 + shortcut BN + residual + ReLU (lane-dense VPU) --------
    slab = pl.BlockSpec((TN * Ho, nsc), lambda i: (i, 0))
    vec = pl.BlockSpec((1, nsc), lambda i: (0, 0))
    out2d = pl.pallas_call(
        _stage3_kernel, grid=(G,),
        in_specs=[slab, slab, vec, vec, vec, vec],
        out_specs=pl.BlockSpec((TN * Ho, nsc), lambda i: (i, 0)),
        out_shape=jax.ShapeDtypeStruct((N * Ho, nsc), jnp.float32),
        compiler_params=cp,
    )(a2_raw, sc_raw, _lane_tile(s2v, Wo), _lane_tile(b2v, Wo),
      _lane_tile(ssv, Wo), _lane_tile(bsv, Wo))

    # TODO(synk): keep the consumer lane-dense/NHWC to drop this output relayout.
    return jnp.transpose(out2d.reshape(N, Ho, Wo, Cout), (0, 3, 1, 2))


def _reference_forward(x_nchw, params, stride, empty_shortcut, matmul_dtype):
    """Pure-JAX reference with the same matmul-operand precision (check only)."""
    x = jnp.transpose(x_nchw, (0, 2, 3, 1)).astype(jnp.float32)
    N, H, W, Cin = x.shape
    Cout = params["w2"].shape[-1]

    def conv(a, w, s, pad):
        return lax.conv_general_dilated(
            a.astype(matmul_dtype), w.astype(matmul_dtype), (s, s),
            ((pad, pad), (pad, pad)),
            dimension_numbers=("NHWC", "HWIO", "NHWC"),
            preferred_element_type=jnp.float32)

    def bn(a, g, b):
        mean = jnp.mean(a, axis=(0, 1, 2), keepdims=True)
        var = jnp.mean((a - mean) ** 2, axis=(0, 1, 2), keepdims=True)
        return ((a - mean) * lax.rsqrt(var + EPS) * g.reshape(1, 1, 1, -1)
                + b.reshape(1, 1, 1, -1))

    o = jax.nn.relu(bn(conv(x, params["w1"], stride, 1), params["g1"], params["b1"]))
    o = bn(conv(o, params["w2"], 1, 1), params["g2"], params["b2"])

    if not empty_shortcut:
        ws = params["ws"].reshape(1, 1, Cin, Cout)
        sc = bn(conv(x, ws, stride, 0), params["gs"], params["bs"])
    elif Cin != Cout:
        sc = x[..., :Cout] if Cin > Cout else jnp.pad(
            x, ((0, 0), (0, 0), (0, 0), (0, Cout - Cin)))
    else:
        sc = x
    return jnp.transpose(jax.nn.relu(o + sc), (0, 3, 1, 2))


if __name__ == "__main__":
    # BasicBlock_customized(h=[4, 8, 8], stride=1, empty_shortcut=False)
    h = (4, 8, 8)
    stride = 1
    empty_shortcut = False
    N, H, W = 2, 16, 16

    key = jax.random.PRNGKey(0)
    ks = jax.random.split(key, 10)
    params = {
        "w1": 0.1 * jax.random.normal(ks[0], (3, 3, h[0], h[1]), jnp.float32),
        "g1": 1.0 + 0.1 * jax.random.normal(ks[1], (1, h[1]), jnp.float32),
        "b1": 0.1 * jax.random.normal(ks[2], (1, h[1]), jnp.float32),
        "w2": 0.1 * jax.random.normal(ks[3], (3, 3, h[1], h[2]), jnp.float32),
        "g2": 1.0 + 0.1 * jax.random.normal(ks[4], (1, h[2]), jnp.float32),
        "b2": 0.1 * jax.random.normal(ks[5], (1, h[2]), jnp.float32),
        "ws": 0.1 * jax.random.normal(ks[6], (h[0], h[2]), jnp.float32),
        "gs": 1.0 + 0.1 * jax.random.normal(ks[7], (1, h[2]), jnp.float32),
        "bs": 0.1 * jax.random.normal(ks[8], (1, h[2]), jnp.float32),
    }
    x = jax.random.normal(ks[9], (N, h[0], H, W), jnp.float32)

    # Exact-precision mode (f32 matmuls, f32 slabs) vs pure-f32 reference.
    out_f32 = jax.block_until_ready(
        basic_block_forward(x, params, stride, empty_shortcut,
                            matmul_dtype=jnp.float32))
    ref_f32 = _reference_forward(x, params, stride, empty_shortcut, jnp.float32)
    assert out_f32.shape == ref_f32.shape == (N, h[2], H // stride, W // stride)
    err_f32 = float(jnp.max(jnp.abs(out_f32 - ref_f32)))
    assert err_f32 < 1e-3, f"f32 max err {err_f32}"

    # MXU-fast mode (bf16 operands + bf16 inter-stage slabs, f32 accumulation)
    # vs matched-matmul-precision reference (intermediates stay f32 in the ref,
    # so allow bf16-storage-level deviation).
    out_bf16 = jax.block_until_ready(
        basic_block_forward(x, params, stride, empty_shortcut,
                            matmul_dtype=jnp.bfloat16))
    ref_bf16 = _reference_forward(x, params, stride, empty_shortcut, jnp.bfloat16)
    err_bf16 = float(jnp.max(jnp.abs(out_bf16 - ref_bf16)))
    assert err_bf16 < 1e-1, f"bf16 max err {err_bf16}"

    print("KERNEL_OK")
</pallas_src>

<mosaic_0001>
module attributes {stable_mosaic.version = 11 : i64} {
  func.func @kernel(%arg0: i32, %arg1: memref<2x4x16x16xf32, #tpu.memory_space<vmem>>, %arg2: memref<3x72x256xf32, #tpu.memory_space<vmem>>, %arg3: memref<32x128xf32, #tpu.memory_space<vmem>>, %arg4: memref<32x128xf32, #tpu.memory_space<vmem>>, %arg5: memref<1x2x128xf32, #tpu.memory_space<vmem>>, %arg6: memref<1x2x128xf32, #tpu.memory_space<vmem>>, %arg7: memref<2x18x72xf32, #tpu.memory_space<vmem>>) attributes {dimension_semantics = [#tpu.dimension_semantics<parallel>], iteration_bounds = array<i64: 1>, scalar_prefetch = 0 : i64, scratch_operands = 1 : i64, tpu.core_type = #tpu.core_type<tc>, window_params = [{transform_indices = @transform_0, window_bounds = array<i64: 2, 4, 16, 16>}, {pipeline_mode = #tpu.pipeline_mode<synchronous>, transform_indices = @transform_1, window_bounds = array<i64: 3, 72, 256>}, {transform_indices = @transform_2, window_bounds = array<i64: 32, 128>}, {transform_indices = @transform_3, window_bounds = array<i64: 32, 128>}, {transform_indices = @transform_4, window_bounds = array<i64: 1, 2, 128>}, {transform_indices = @transform_5, window_bounds = array<i64: 1, 2, 128>}]} {
    %cst = arith.constant 0.000000e+00 : f32
    %0 = vector.broadcast %cst : f32 to vector<2x18x72xf32>
    %c0 = arith.constant 0 : index
    %c0_0 = arith.constant 0 : index
    %c0_1 = arith.constant 0 : index
    %1 = vector.load %arg7[%c0, %c0_0, %c0_1] : memref<2x18x72xf32, #tpu.memory_space<vmem>>, vector<2x18x72xf32>
    tpu.vector_store %arg7[%c0, %c0_0, %c0_1], %0 {strides = array<i32>} : memref<2x18x72xf32, #tpu.memory_space<vmem>>, vector<2x18x72xf32>,
    %c0_2 = arith.constant 0 : index
    %c0_3 = arith.constant 0 : index
    %c0_4 = arith.constant 0 : index
    %c0_5 = arith.constant 0 : index
    %2 = vector.load %arg1[%c0_2, %c0_3, %c0_4, %c0_5] : memref<2x4x16x16xf32, #tpu.memory_space<vmem>>, vector<2x4x16x16xf32>
    %3 = vector.extract_strided_slice %2 {offsets = [0, 0, 0, 0], sizes = [2, 1, 16, 16], strides = [1, 1, 1, 1]} : vector<2x4x16x16xf32> to vector<2x1x16x16xf32>
    %4 = vector.shape_cast %3 : vector<2x1x16x16xf32> to vector<2x16x16xf32>
    %c0_6 = arith.constant 0 : index
    %c1 = arith.constant 1 : index
    %c1_7 = arith.constant 1 : index
    %5 = vector.load %arg7[%c0_6, %c1, %c1_7] : memref<2x18x72xf32, #tpu.memory_space<vmem>>, vector<2x16x16xf32>
    tpu.vector_store %arg7[%c0_6, %c1, %c1_7], %4 {strides = array<i32>} : memref<2x18x72xf32, #tpu.memory_space<vmem>>, vector<2x16x16xf32>,
    %6 = vector.extract_strided_slice %2 {offsets = [0, 1, 0, 0], sizes = [2, 1, 16, 16], strides = [1, 1, 1, 1]} : vector<2x4x16x16xf32> to vector<2x1x16x16xf32>
    %7 = vector.shape_cast %6 : vector<2x1x16x16xf32> to vector<2x16x16xf32>
    %c0_8 = arith.constant 0 : index
    %c1_9 = arith.constant 1 : index
    %c19 = arith.constant 19 : index
    %8 = vector.load %arg7[%c0_8, %c1_9, %c19] : memref<2x18x72xf32, #tpu.memory_space<vmem>>, vector<2x16x16xf32>
    tpu.vector_store %arg7[%c0_8, %c1_9, %c19], %7 {strides = array<i32>} : memref<2x18x72xf32, #tpu.memory_space<vmem>>, vector<2x16x16xf32>,
    %9 = vector.extract_strided_slice %2 {offsets = [0, 2, 0, 0], sizes = [2, 1, 16, 16], strides = [1, 1, 1, 1]} : vector<2x4x16x16xf32> to vector<2x1x16x16xf32>
    %10 = vector.shape_cast %9 : vector<2x1x16x16xf32> to vector<2x16x16xf32>
    %c0_10 = arith.constant 0 : index
    %c1_11 = arith.constant 1 : index
    %c37 = arith.constant 37 : index
    %11 = vector.load %arg7[%c0_10, %c1_11, %c37] : memref<2x18x72xf32, #tpu.memory_space<vmem>>, vector<2x16x16xf32>
    tpu.vector_store %arg7[%c0_10, %c1_11, %c37], %10 {strides = array<i32>} : memref<2x18x72xf32, #tpu.memory_space<vmem>>, vector<2x16x16xf32>,
    %12 = vector.extract_strided_slice %2 {offsets = [0, 3, 0, 0], sizes = [2, 1, 16, 16], strides = [1, 1, 1, 1]} : vector<2x4x16x16xf32> to vector<2x1x16x16xf32>
    %13 = vector.shape_cast %12 : vector<2x1x16x16xf32> to vector<2x16x16xf32>
    %c0_12 = arith.constant 0 : index
    %c1_13 = arith.constant 1 : index
    %c55 = arith.constant 55 : index
    %14 = vector.load %arg7[%c0_12, %c1_13, %c55] : memref<2x18x72xf32, #tpu.memory_space<vmem>>, vector<2x16x16xf32>
    tpu.vector_store %arg7[%c0_12, %c1_13, %c55], %13 {strides = array<i32>} : memref<2x18x72xf32, #tpu.memory_space<vmem>>, vector<2x16x16xf32>,
    %c0_14 = arith.constant 0 : index
    %c0_15 = arith.constant 0 : index
    %c0_16 = arith.constant 0 : index
    %15 = vector.load %arg7[%c0_14, %c0_15, %c0_16] : memref<2x18x72xf32, #tpu.memory_space<vmem>>, vector<2x18x72xf32>
    %16 = vector.extract_strided_slice %15 {offsets = [0, 0, 0], sizes = [2, 16, 72], strides = [1, 1, 1]} : vector<2x18x72xf32> to vector<2x16x72xf32>
    %17 = vector.shape_cast %16 : vector<2x16x72xf32> to vector<32x72xf32>
    %c0_17 = arith.constant 0 : index
    %c0_18 = arith.constant 0 : index
    %c0_19 = arith.constant 0 : index
    %18 = vector.load %arg2[%c0_17, %c0_18, %c0_19] : memref<3x72x256xf32, #tpu.memory_space<vmem>>, vector<1x72x256xf32>
    %19 = vector.shape_cast %18 : vector<1x72x256xf32> to vector<72x256xf32>
    %cst_20 = arith.constant dense<0.000000e+00> : vector<32x256xf32>
    %20 = tpu.matmul %17, %19, %cst_20 {dimension_numbers = #tpu.dot_dimension_numbers<[1], [0], [0], [1], [0, 0, 1, 1], [], []>} : vector<32x72xf32>, vector<72x256xf32>, vector<32x256xf32> -> vector<32x256xf32>
    %21 = vector.extract_strided_slice %15 {offsets = [0, 1, 0], sizes = [2, 16, 72], strides = [1, 1, 1]} : vector<2x18x72xf32> to vector<2x16x72xf32>
    %22 = vector.shape_cast %21 : vector<2x16x72xf32> to vector<32x72xf32>
    %c1_21 = arith.constant 1 : index
    %c0_22 = arith.constant 0 : index
    %c0_23 = arith.constant 0 : index
    %23 = vector.load %arg2[%c1_21, %c0_22, %c0_23] : memref<3x72x256xf32, #tpu.memory_space<vmem>>, vector<1x72x256xf32>
    %24 = vector.shape_cast %23 : vector<1x72x256xf32> to vector<72x256xf32>
    %cst_24 = arith.constant dense<0.000000e+00> : vector<32x256xf32>
    %25 = tpu.matmul %22, %24, %cst_24 {dimension_numbers = #tpu.dot_dimension_numbers<[1], [0], [0], [1], [0, 0, 1, 1], [], []>} : vector<32x72xf32>, vector<72x256xf32>, vector<32x256xf32> -> vector<32x256xf32>
    %26 = arith.addf %20, %25 : vector<32x256xf32>
    %27 = vector.extract_strided_slice %15 {offsets = [0, 2, 0], sizes = [2, 16, 72], strides = [1, 1, 1]} : vector<2x18x72xf32> to vector<2x16x72xf32>
    %28 = vector.shape_cast %27 : vector<2x16x72xf32> to vector<32x72xf32>
    %c2 = arith.constant 2 : index
    %c0_25 = arith.constant 0 : index
    %c0_26 = arith.constant 0 : index
    %29 = vector.load %arg2[%c2, %c0_25, %c0_26] : memref<3x72x256xf32, #tpu.memory_space<vmem>>, vector<1x72x256xf32>
    %30 = vector.shape_cast %29 : vector<1x72x256xf32> to vector<72x256xf32>
    %cst_27 = arith.constant dense<0.000000e+00> : vector<32x256xf32>
    %31 = tpu.matmul %28, %30, %cst_27 {dimension_numbers = #tpu.dot_dimension_numbers<[1], [0], [0], [1], [0, 0, 1, 1], [], []>} : vector<32x72xf32>, vector<72x256xf32>, vector<32x256xf32> -> vector<32x256xf32>
    %32 = arith.addf %26, %31 : vector<32x256xf32>
    %33 = vector.extract_strided_slice %32 {offsets = [0, 0], sizes = [32, 128], strides = [1, 1]} : vector<32x256xf32> to vector<32x128xf32>
    %34 = vector.extract_strided_slice %32 {offsets = [0, 128], sizes = [32, 128], strides = [1, 1]} : vector<32x256xf32> to vector<32x128xf32>
    %cst_28 = arith.constant dense<0.000000e+00> : vector<128xf32>
    %35 = vector.multi_reduction <add>, %33, %cst_28 [0] : vector<32x128xf32> to vector<128xf32>
    %36 = vector.shape_cast %35 : vector<128xf32> to vector<1x128xf32>
    %37 = arith.mulf %33, %33 : vector<32x128xf32>
    %cst_29 = arith.constant dense<0.000000e+00> : vector<128xf32>
    %38 = vector.multi_reduction <add>, %37, %cst_29 [0] : vector<32x128xf32> to vector<128xf32>
    %39 = vector.shape_cast %38 : vector<128xf32> to vector<1x128xf32>
    %40 = tpu.concatenate %36, %39 in 0 : vector<1x128xf32>, vector<1x128xf32> -> vector<2x128xf32>
    %41 = vector.shape_cast %40 : vector<2x128xf32> to vector<1x2x128xf32>
    %c0_30 = arith.constant 0 : index
    %c0_31 = arith.constant 0 : index
    %c0_32 = arith.constant 0 : index
    %42 = vector.load %arg5[%c0_30, %c0_31, %c0_32] : memref<1x2x128xf32, #tpu.memory_space<vmem>>, vector<1x2x128xf32>
    tpu.vector_store %arg5[%c0_30, %c0_31, %c0_32], %41 {strides = array<i32>} : memref<1x2x128xf32, #tpu.memory_space<vmem>>, vector<1x2x128xf32>,
    %cst_33 = arith.constant dense<0.000000e+00> : vector<128xf32>
    %43 = vector.multi_reduction <add>, %34, %cst_33 [0] : vector<32x128xf32> to vector<128xf32>
    %44 = vector.shape_cast %43 : vector<128xf32> to vector<1x128xf32>
    %45 = arith.mulf %34, %34 : vector<32x128xf32>
    %cst_34 = arith.constant dense<0.000000e+00> : vector<128xf32>
    %46 = vector.multi_reduction <add>, %45, %cst_34 [0] : vector<32x128xf32> to vector<128xf32>
    %47 = vector.shape_cast %46 : vector<128xf32> to vector<1x128xf32>
    %48 = tpu.concatenate %44, %47 in 0 : vector<1x128xf32>, vector<1x128xf32> -> vector<2x128xf32>
    %49 = vector.shape_cast %48 : vector<2x128xf32> to vector<1x2x128xf32>
    %c0_35 = arith.constant 0 : index
    %c0_36 = arith.constant 0 : index
    %c0_37 = arith.constant 0 : index
    %50 = vector.load %arg6[%c0_35, %c0_36, %c0_37] : memref<1x2x128xf32, #tpu.memory_space<vmem>>, vector<1x2x128xf32>
    tpu.vector_store %arg6[%c0_35, %c0_36, %c0_37], %49 {strides = array<i32>} : memref<1x2x128xf32, #tpu.memory_space<vmem>>, vector<1x2x128xf32>,
    %c0_38 = arith.constant 0 : index
    %c0_39 = arith.constant 0 : index
    %51 = vector.load %arg3[%c0_38, %c0_39] : memref<32x128xf32, #tpu.memory_space<vmem>>, vector<32x128xf32>
    tpu.vector_store %arg3[%c0_38, %c0_39], %33 {strides = array<i32>} : memref<32x128xf32, #tpu.memory_space<vmem>>, vector<32x128xf32>,
    %c0_40 = arith.constant 0 : index
    %c0_41 = arith.constant 0 : index
    %52 = vector.load %arg4[%c0_40, %c0_41] : memref<32x128xf32, #tpu.memory_space<vmem>>, vector<32x128xf32>
    tpu.vector_store %arg4[%c0_40, %c0_41], %34 {strides = array<i32>} : memref<32x128xf32, #tpu.memory_space<vmem>>, vector<32x128xf32>,
    return
  }
  func.func @transform_0(%arg0: i32) -> (i32, i32, i32, i32) {
    %c0_i32 = arith.constant 0 : i32
    %c0_i32_0 = arith.constant 0 : i32
    %c0_i32_1 = arith.constant 0 : i32
    %c0_i32_2 = arith.constant 0 : i32
    return %arg0, %c0_i32, %c0_i32_0, %c0_i32_1 : i32, i32, i32, i32
  }
  func.func @transform_1(%arg0: i32) -> (i32, i32, i32) {
    %c0_i32 = arith.constant 0 : i32
    %c0_i32_0 = arith.constant 0 : i32
    %c0_i32_1 = arith.constant 0 : i32
    %c0_i32_2 = arith.constant 0 : i32
    return %c0_i32, %c0_i32_0, %c0_i32_1 : i32, i32, i32
  }
  func.func @transform_2(%arg0: i32) -> (i32, i32) {
    %c0_i32 = arith.constant 0 : i32
    %c0_i32_0 = arith.constant 0 : i32
    return %arg0, %c0_i32 : i32, i32
  }
  func.func @transform_3(%arg0: i32) -> (i32, i32) {
    %c0_i32 = arith.constant 0 : i32
    %c0_i32_0 = arith.constant 0 : i32
    return %arg0, %c0_i32 : i32, i32
  }
  func.func @transform_4(%arg0: i32) -> (i32, i32, i32) {
    %c0_i32 = arith.constant 0 : i32
    %c0_i32_0 = arith.constant 0 : i32
    %c0_i32_1 = arith.constant 0 : i32
    return %arg0, %c0_i32, %c0_i32_0 : i32, i32, i32
  }
  func.func @transform_5(%arg0: i32) -> (i32, i32, i32) {
    %c0_i32 = arith.constant 0 : i32
    %c0_i32_0 = arith.constant 0 : i32
    %c0_i32_1 = arith.constant 0 : i32
    return %arg0, %c0_i32, %c0_i32_0 : i32, i32, i32
  }
}

</mosaic_0001>

<bundles_post_ra>
// kernel: tpu_custom_call.1
= control target key start
LH: loop header
LB: loop body
LE: loop exit
PB: predicated region body
PF: predicated region fallthrough
CT: control target
= control target key end

     0   :  { %11 = vsyncpa [#allocation4], 0  ;;  %s1139_s0 = inlined_call_operand.hbm [shape: f32[2,4,16,16], index: 0, kind: input, shape index: {}]   ;;  %s1140_s1 = inlined_call_operand.hbm [shape: f32[3,72,256], index: 1, kind: input, shape index: {}]   ;;  %s1141_s2 = inlined_call_operand.hbm [shape: f32[32,128], index: 2, kind: output, shape index: {0}]   ;;  %s1142_s3 = inlined_call_operand.hbm [shape: f32[32,128], index: 3, kind: output, shape index: {1}]   ;;  %s1143_s4 = inlined_call_operand.hbm [shape: f32[1,2,128], index: 4, kind: output, shape index: {2}]   ;;  %s1144_s5 = inlined_call_operand.hbm [shape: f32[1,2,128], index: 5, kind: output, shape index: {3}]  }
   0x1   :  { %12 = vsyncpa [#allocation7], 0 }
   0x2   :  { %13 = vsyncpa [#allocation5], 0 }
   0x3   :  { %14 = vsyncpa [#allocation10], 0 }
   0x4   :  { %15 = vsyncpa [#allocation13], 0  ;;  %s904_s18 = smov [#allocation3]   ;;  %s762_s22 = scalar_lea.hbm %s1139_s0, 2048 }
   0x5   :  { %s21_s19 = sshll.u32 %s904_s18, 4  ;;  %p763_p0 = scmp.ne.s32.totalorder %s1139_s0, %s762_s22  ;;  %s22_s19 = int_to_ptr.vmem [resolvable:$true] %s21_s19 }
   0x6   :  { %p766_p1 = scmp.lt.u32.totalorder %s762_s22, %s1139_s0 }
   0x8   :  { %p768_p2 = pnand %p766_p1, %p763_p0 }
   0xa   :  { %771 = shalt.err (!%p768_p2)
}
   0xb   :  { %s772_s27 = scalar_lea.vmem %s22_s19, 2048  ;;  %p777_p4 = scmp.lt.s32.totalorder %s22_s19, %s22_s19 }
   0xc   :  { %p773_p3 = scmp.ne.s32.totalorder %s22_s19, %s772_s27  ;;  %p778_p5 = scmp.lt.s32.totalorder %s772_s27, %s772_s27 }
   0xe   :  { %p779_p6 = por %p778_p5, %p777_p4 }
  0x10   :  { %p780_p7 = pnand %p779_p6, %p773_p3 }
  0x12   :  { %783 = shalt.err (!%p780_p7)
}
  0x13   :  { %s905_s28 = smov 128   ;;  %s906_s29 = smov 8  }
  0x14   :  { %27 = dma.hbm_to_vmem [thread:$0]  %s1139_s0, 2048, %s22_s19, [#allocation4], %s905_s28, %s905_s28, %s906_s29  }
  0x15   :  { %s907_s7 = smov [#allocation6]   ;;  %s784_s11 = scalar_lea.hbm %s1140_s1, 6912 }
  0x16   :  { %s33_s8 = sshll.u32 %s907_s7, 4  ;;  %p785_p8 = scmp.ne.s32.totalorder %s1140_s1, %s784_s11  ;;  %s34_s8 = int_to_ptr.vmem [resolvable:$true] %s33_s8 }
  0x17   :  { %p788_p9 = scmp.lt.u32.totalorder %s784_s11, %s1140_s1 }
  0x19   :  { %p790_p10 = pnand %p788_p9, %p785_p8 }
  0x1b   :  { %793 = shalt.err (!%p790_p10)
}
  0x1c   :  { %s794_s16 = scalar_lea.vmem %s34_s8, 6912  ;;  %p799_p12 = scmp.lt.s32.totalorder %s34_s8, %s34_s8 }
  0x1d   :  { %p795_p11 = scmp.ne.s32.totalorder %s34_s8, %s794_s16  ;;  %p800_p13 = scmp.lt.s32.totalorder %s794_s16, %s794_s16 }
  0x1f   :  { %p801_p0 = por %p800_p13, %p799_p12 }
  0x21   :  { %p802_p1 = pnand %p801_p0, %p795_p11 }
  0x23   :  { %805 = shalt.err (!%p802_p1)
}
  0x24   :  { %s908_s0 = smov 256   ;;  %s909_s17 = smov 16  }
  0x25   :  { %39 = dma.hbm_to_vmem [thread:$0]  %s1140_s1, 6912, %s34_s8, [#allocation7], %s908_s0, %s908_s0, %s909_s17  }
  0x26   :  { %894 = dma.done.wait [#allocation4], 2048  }
  0x27   :  { %895 = vsyncadd [#allocation4], 4294965248 }
  0x28   :  { %896 = dma.done.wait [#allocation7], 6912  }
  0x29   :  { %897 = vsyncadd [#allocation7], 4294960384  ;;  %vm46_vm0 = vcmask 588800   ;;  %v910_v0 = vmov 0.0   ;;  %vm49_vm1 = vcmask 582656   ;;  %v56_v1 = vld [vmem:[#allocation3 + $0x10] sm:$0xff] }
  0x2a   :  { %47 = vst.msk [vmem:[#allocation2] sm:$0xff] %vm46_vm0, %v910_v0  ;;  %48 = vst.msk [vmem:[#allocation2 + $0x8] sm:$0xff] %vm46_vm0, %v910_v0  ;;  %383 = vmatprep.mubr.f32.mxu0 %v910_v0  ;;  %286 = vmatprep.mubr.f32.mxu1 %v910_v0  ;;  %v54_v2 = vld [vmem:[#allocation3] sm:$0xff]  ;;  %s911_s1 = smov 19   ;;  %s912_s20 = smov 1   ;;  %v57_v3 = vld [vmem:[#allocation3 + $0x18] sm:$0xff] }
  0x2b   :  { %51 = vst.msk [vmem:[#allocation2 + $0x18] sm:$0xff] %vm46_vm0, %v910_v0  ;;  %52 = vst.msk [vmem:[#allocation2 + $0x20] sm:$0xff] %vm46_vm0, %v910_v0  ;;  %95 = vrot.lane.b32.xlu1 %v56_v1, %s911_s1  ;;  %74 = vrot.lane.b32.xlu0 %v54_v2, %s912_s20  ;;  %v55_v4 = vld [vmem:[#allocation3 + $0x8] sm:$0xff]  ;;  %v58_v6 = vld [vmem:[#allocation3 + $0x20] sm:$0xff]  ;;  %s913_s21 = smov 37   ;;  %s914_s22 = smov 55  }
  0x2c   :  { %50 = vst.msk [vmem:[#allocation2 + $0x10] sm:$0x3] %vm49_vm1, %v910_v0  ;;  %53 = vst.msk [vmem:[#allocation2 + $0x28] sm:$0x3] %vm49_vm1, %v910_v0  ;;  %v59_v5 = vld [vmem:[#allocation3 + $0x28] sm:$0xff]  ;;  %v163_v8 = vld [vmem:[#allocation6 + $0x18] sm:$0xff] }
  0x2d   :  { %v161_v7 = vld [vmem:[#allocation6 + $0x8] sm:$0xff]  ;;  %v160_v10 = vld [vmem:[#allocation6] sm:$0xff]  ;;  %v162_v11 = vld [vmem:[#allocation6 + $0x10] sm:$0xff]  ;;  %vm86_vm2 = vcmask 138248   ;;  %vm107_vm3 = vcmask 285848   ;;  %vm128_vm4 = vcmask 433448  }
  0x2e   :  { %v689_v9 = vpack.c.bf16 %v163_v8, %v161_v7  ;;  %v197_v12 = vld [vmem:[#allocation6 + $0x98] sm:$0xff]  ;;  %v691_v13 = vpack.c.bf16 %v162_v11, %v160_v10  ;;  %v199_v14 = vld [vmem:[#allocation6 + $0xa8] sm:$0xff]  ;;  %v196_v15 = vld [vmem:[#allocation6 + $0x90] sm:$0xff]  ;;  %vm149_vm5 = vcmask 581048   ;;  %vm184_vm6 = vcmask 1046528   ;;  %s915_s23 = smov [#allocation8]  }
  0x2f   :  { %97 = vrot.lane.b32.xlu1 %v57_v3, %s911_s1  ;;  %76 = vrot.lane.b32.xlu0 %v55_v4, %s912_s20  ;;  %v198_v16 = vld [vmem:[#allocation6 + $0xa0] sm:$0xff]  ;;  %v61_v17 = vld [vmem:[#allocation3 + $0x38] sm:$0xff]  ;;  %v60_v18 = vld [vmem:[#allocation3 + $0x30] sm:$0xff]  ;;  %v673_v19 = vpack.c.bf16 %v199_v14, %v197_v12  ;;  %vm408_vm7 = vcmask 1045504   ;;  %s605_s24 = sshll.u32 %s915_s23, 4  ;;  %s916_s25 = smov [#allocation9]   ;;  %s1064_s24 = int_to_ptr.vmem [resolvable:$true] %s605_s24 }
  0x30   :  { %690 = vmatprep.subr.bf16.mxu0 %v689_v9  ;;  %v675_v20 = vpack.c.bf16 %v198_v16, %v196_v15  ;;  %v165_v21 = vld [vmem:[#allocation6 + $0x28] sm:$0xff]  ;;  %v167_v22 = vld [vmem:[#allocation6 + $0x38] sm:$0xff]  ;;  %v164_v23 = vld [vmem:[#allocation6 + $0x20] sm:$0xff]  ;;  %s617_s26 = sshll.u32 %s916_s25, 4  ;;  %s806_s27 = scalar_lea.vmem %s1064_s24, 512  ;;  %s1066_s26 = int_to_ptr.vmem [resolvable:$true] %s617_s26 }
  0x31   :  { %v693_v24 = vpack.c.bf16 %v167_v22, %v165_v21  ;;  %v166_v25 = vld [vmem:[#allocation6 + $0x30] sm:$0xff]  ;;  %v201_v26 = vld [vmem:[#allocation6 + $0xb8] sm:$0xff]  ;;  %v203_v27 = vld [vmem:[#allocation6 + $0xc8] sm:$0xff]  ;;  %692 = vmatpush1.bf16.msra.mxu0 %v691_v13  ;;  %674 = vmatprep.subr.bf16.mxu1 %v673_v19  ;;  %p807_p2 = scmp.ne.s32.totalorder %s1064_s24, %s806_s27  ;;  %p811_p3 = scmp.lt.s32.totalorder %s1064_s24, %s1064_s24 }
  0x32   :  { %v695_v28 = vpack.c.bf16 %v166_v25, %v164_v23  ;;  %v677_v29 = vpack.c.bf16 %v203_v27, %v201_v26  ;;  %v200_v30 = vld [vmem:[#allocation6 + $0xb0] sm:$0xff]  ;;  %v202_v31 = vld [vmem:[#allocation6 + $0xc0] sm:$0xff]  ;;  %v169_v32 = vld [vmem:[#allocation6 + $0x48] sm:$0xff]  ;;  %676 = vmatpush1.bf16.msra.mxu1 %v675_v20  ;;  %p812_p4 = scmp.lt.s32.totalorder %s806_s27, %s806_s27 }
  0x33   :  { %118 = vrot.lane.b32.xlu1 %v59_v5, %s913_s21  ;;  %116 = vrot.lane.b32.xlu0 %v58_v6, %s913_s21  ;;  %v679_v33 = vpack.c.bf16 %v202_v31, %v200_v30  ;;  %v171_v34 = vld [vmem:[#allocation6 + $0x58] sm:$0xff]  ;;  %v168_v35 = vld [vmem:[#allocation6 + $0x40] sm:$0xff]  ;;  %v170_v36 = vld [vmem:[#allocation6 + $0x50] sm:$0xff] }
  0x34   :  { %694 = vmatprep.subr.bf16.mxu0 %v693_v24  ;;  %678 = vmatprep.subr.bf16.mxu1 %v677_v29  ;;  %v697_v37 = vpack.c.bf16 %v171_v34, %v169_v32  ;;  %v205_v38 = vld [vmem:[#allocation6 + $0xd8] sm:$0xff]  ;;  %v207_v39 = vld [vmem:[#allocation6 + $0xe8] sm:$0xff]  ;;  %v204_v40 = vld [vmem:[#allocation6 + $0xd0] sm:$0xff]  ;;  %v699_v47 = vpack.c.bf16 %v170_v36, %v168_v35  ;;  %p813_p5 = por %p812_p4, %p811_p3 }
  0x35   :  { %v681_v41 = vpack.c.bf16 %v207_v39, %v205_v38  ;;  %v206_v42 = vld [vmem:[#allocation6 + $0xe0] sm:$0xff]  ;;  %v173_v43 = vld [vmem:[#allocation6 + $0x68] sm:$0xff]  ;;  %v175_v44 = vld [vmem:[#allocation6 + $0x78] sm:$0xff]  ;;  %696 = vmatpush1.bf16.msra.mxu0 %v695_v28 }
  0x36   :  { %v63_v45 = vld [vmem:[#allocation3 + $0x48] sm:$0xff]  ;;  %v62_v46 = vld [vmem:[#allocation3 + $0x40] sm:$0xff]  ;;  %v209_v48 = vld [vmem:[#allocation6 + $0xf8] sm:$0xff]  ;;  %680 = vmatpush1.bf16.msra.mxu1 %v679_v33  ;;  %698 = vmatprep.subr.bf16.mxu0 %v697_v37  ;;  %v683_v49 = vpack.c.bf16 %v206_v42, %v204_v40  ;;  %v701_v50 = vpack.c.bf16 %v175_v44, %v173_v43  ;;  %p814_p6 = pnand %p813_p5, %p807_p2 }
  0x37   :  { %139 = vrot.lane.b32.xlu1 %v61_v17, %s914_s22  ;;  %137 = vrot.lane.b32.xlu0 %v60_v18, %s914_s22  ;;  %v172_v51 = vld [vmem:[#allocation6 + $0x60] sm:$0xff]  ;;  %v174_v52 = vld [vmem:[#allocation6 + $0x70] sm:$0xff]  ;;  %v211_v53 = vld [vmem:[#allocation6 + $0x108] sm:$0xff] }
  0x38   :  { %682 = vmatprep.subr.bf16.mxu1 %v681_v41  ;;  %v685_v54 = vpack.c.bf16 %v211_v53, %v209_v48  ;;  %v208_v55 = vld [vmem:[#allocation6 + $0xf0] sm:$0xff]  ;;  %v210_v56 = vld [vmem:[#allocation6 + $0x100] sm:$0xff]  ;;  %v65_v57 = vld [vmem:[#allocation3 + $0x58] sm:$0xff]  ;;  %v703_v59 = vpack.c.bf16 %v174_v52, %v172_v51 }
  0x39   :  { %v64_v58 = vld [vmem:[#allocation3 + $0x50] sm:$0xff]  ;;  %700 = vmatpush1.bf16.msra.mxu0 %v699_v47  ;;  %v687_v60 = vpack.c.bf16 %v210_v56, %v208_v55  ;;  %v177_v61 = vld [vmem:[#allocation6 + $0x88] sm:$0xff]  ;;  %v423_v63 = vld [vmem:[#allocation6 + $0x138] sm:$0xff] }
  0x3a   :  { %684 = vmatpush1.bf16.msra.mxu1 %v683_v49  ;;  %702 = vmatprep.subr.bf16.mxu0 %v701_v50  ;;  %v421_v62 = vld [vmem:[#allocation6 + $0x128] sm:$0xff]  ;;  %v213_v1 = vld [vmem:[#allocation6 + $0x118] sm:$0xff]  ;;  %v66_v3 = vld [vmem:[#allocation3 + $0x60] sm:$0xff] }
  0x3b   :  { %80 = vrot.lane.b32.xlu1 %v63_v45, %s912_s20  ;;  %78 = vrot.lane.b32.xlu0 %v62_v46, %s912_s20  ;;  %v67_v2 = vld [vmem:[#allocation3 + $0x68] sm:$0xff]  ;;  %v176_v4 = vld [vmem:[#allocation6 + $0x80] sm:$0xff]  ;;  %v705_v5 = vpack.c.bf16 %v423_v63, %v421_v62  ;;  %v212_v6 = vld [vmem:[#allocation6 + $0x110] sm:$0xff] }
  0x3c   :  { %686 = vmatprep.subr.bf16.mxu1 %v685_v54  ;;  %v69_v7 = vld [vmem:[#allocation3 + $0x78] sm:$0xff]  ;;  %v68_v8 = vld [vmem:[#allocation3 + $0x70] sm:$0xff]  ;;  %v420_v17 = vld [vmem:[#allocation6 + $0x120] sm:$0xff] }
  0x3d   :  { %704 = vmatpush1.bf16.msra.mxu0 %v703_v59  ;;  %v422_v18 = vld [vmem:[#allocation6 + $0x130] sm:$0xff]  ;;  %v425_v21 = vld [vmem:[#allocation6 + $0x148] sm:$0xff]  ;;  %v427_v22 = vld [vmem:[#allocation6 + $0x158] sm:$0xff] }
  0x3e   :  { %688 = vmatpush1.bf16.msra.mxu1 %v687_v60  ;;  %335 = vmatprep.subr.mxu0 %v177_v61  ;;  %v707_v23 = vpack.c.bf16 %v422_v18, %v420_v17  ;;  %v424_v24 = vld [vmem:[#allocation6 + $0x140] sm:$0xff]  ;;  %v709_v25 = vpack.c.bf16 %v427_v22, %v425_v21  ;;  %v426_v26 = vld [vmem:[#allocation6 + $0x150] sm:$0xff]  ;;  %v429_v27 = vld [vmem:[#allocation6 + $0x168] sm:$0xff] }
  0x3f   :  { %101 = vrot.lane.b32.xlu1 %v65_v57, %s911_s1  ;;  %99 = vrot.lane.b32.xlu0 %v64_v58, %s911_s1  ;;  %v431_v28 = vld [vmem:[#allocation6 + $0x178] sm:$0xff]  ;;  %v711_v36 = vpack.c.bf16 %v426_v26, %v424_v24  ;;  %v428_v40 = vld [vmem:[#allocation6 + $0x160] sm:$0xff]  ;;  %v430_v41 = vld [vmem:[#allocation6 + $0x170] sm:$0xff] }
  0x40   :  { %238 = vmatprep.subr.mxu1 %v213_v1  ;;  %v713_v39 = vpack.c.bf16 %v431_v28, %v429_v27  ;;  %v433_v44 = vld [vmem:[#allocation6 + $0x188] sm:$0xff]  ;;  %v435_v45 = vld [vmem:[#allocation6 + $0x198] sm:$0xff]  ;;  %v715_v46 = vpack.c.bf16 %v430_v41, %v428_v40  ;;  %v432_v49 = vld [vmem:[#allocation6 + $0x180] sm:$0xff] }
  0x41   :  { %336 = vmatpush1.msra.mxu0 %v176_v4  ;;  %v717_v48 = vpack.c.bf16 %v435_v45, %v433_v44  ;;  %v434_v50 = vld [vmem:[#allocation6 + $0x190] sm:$0xff]  ;;  %v437_v54 = vld [vmem:[#allocation6 + $0x1a8] sm:$0xff]  ;;  %v436_v55 = vld [vmem:[#allocation6 + $0x1a0] sm:$0xff] }
  0x42   :  { %239 = vmatpush1.msra.mxu1 %v212_v6  ;;  %706 = vmatprep.subr.bf16.mxu0 %v705_v5  ;;  %v719_v53 = vpack.c.bf16 %v434_v50, %v432_v49 }
  0x43   :  { %122 = vrot.lane.b32.xlu1 %v67_v2, %s913_s21  ;;  %120 = vrot.lane.b32.xlu0 %v66_v3, %s913_s21 }
  0x44   :  { %721 = vmatprep.subr.bf16.mxu1 %v705_v5 }
  0x47   :  { %143 = vrot.lane.b32.xlu1 %v69_v7, %s914_s22  ;;  %141 = vrot.lane.b32.xlu0 %v68_v8, %s914_s22 }
  0x9d   :  { %v96_v9 = vpop.permute.xlu1 %95  ;;  %v75_v10 = vpop.permute.xlu0 %74 }
  0x9e   :  { %87 = vst.msk [vmem:[#allocation2 + $0x1] sm:$0xff] %vm86_vm2, %v75_v10 }
  0x9f   :  { %108 = vst.msk [vmem:[#allocation2 + $0x1] sm:$0xff] %vm107_vm3, %v96_v9 }
  0xa1   :  { %v98_v11 = vpop.permute.xlu1 %97  ;;  %v77_v12 = vpop.permute.xlu0 %76 }
  0xa2   :  { %88 = vst.msk [vmem:[#allocation2 + $0x9] sm:$0xff] %vm86_vm2, %v77_v12 }
  0xa3   :  { %109 = vst.msk [vmem:[#allocation2 + $0x9] sm:$0xff] %vm107_vm3, %v98_v11 }
  0xa5   :  { %v119_v13 = vpop.permute.xlu1 %118  ;;  %v117_v14 = vpop.permute.xlu0 %116 }
  0xa6   :  { %130 = vst.msk [vmem:[#allocation2 + $0x9] sm:$0xff] %vm128_vm4, %v119_v13  ;;  %129 = vst.msk [vmem:[#allocation2 + $0x1] sm:$0xff] %vm128_vm4, %v117_v14 }
  0xa9   :  { %v140_v15 = vpop.permute.xlu1 %139  ;;  %v138_v16 = vpop.permute.xlu0 %137 }
  0xaa   :  { %151 = vst.msk [vmem:[#allocation2 + $0x9] sm:$0xff] %vm149_vm5, %v140_v15  ;;  %150 = vst.msk [vmem:[#allocation2 + $0x1] sm:$0xff] %vm149_vm5, %v138_v16 }
  0xad   :  { %v81_v19 = vpop.permute.xlu1 %80  ;;  %v79_v20 = vpop.permute.xlu0 %78 }
  0xae   :  { %90 = vst.msk [vmem:[#allocation2 + $0x21] sm:$0xff] %vm86_vm2, %v81_v19  ;;  %89 = vst.msk [vmem:[#allocation2 + $0x19] sm:$0xff] %vm86_vm2, %v79_v20 }
  0xb1   :  { %v102_v29 = vpop.permute.xlu1 %101  ;;  %v100_v30 = vpop.permute.xlu0 %99  ;;  %v1014_v31 = vld [vmem:[#allocation2] sm:$0xff]  ;;  %v1016_v32 = vld [vmem:[#allocation2 + $0x8] sm:$0xff]  ;;  %v1018_v33 = vld [vmem:[#allocation2 + $0x10] sm:$0x3] }
  0xb2   :  { %111 = vst.msk [vmem:[#allocation2 + $0x21] sm:$0xff] %vm107_vm3, %v102_v29  ;;  %110 = vst.msk [vmem:[#allocation2 + $0x19] sm:$0xff] %vm107_vm3, %v100_v30  ;;  %v185_v34 = vrot.slane %v1014_v31, 1  ;;  %665 = vmatmul.mubr.msk.f32.vlgmr.msra.gmra.mrb[0].mxu0 %vm46_vm0, %v1014_v31  ;;  %v186_v35 = vrot.slane %v1016_v32, 1  ;;  %v188_v38 = vrot.slane %v1018_v33, 1  ;;  %v409_v63 = vrot.slane %v1014_v31, 2 }
  0xb3   :  { %389 = vmatprep.mubr.f32.mxu0 %v910_v0  ;;  %708 = vmatpush1.bf16.msra.mxu0 %v707_v23  ;;  %v410_v1 = vrot.slane %v1016_v32, 2  ;;  %v412_v6 = vrot.slane %v1018_v33, 2 }
  0xb4   :  { %v187_v37 = vsel %vm184_vm6, %v185_v34, %v186_v35  ;;  %710 = vmatprep.subr.bf16.mxu0 %v709_v25  ;;  %v189_v47 = vsel %vm184_vm6, %v186_v35, %v188_v38 }
  0xb5   :  { %v123_v42 = vpop.permute.xlu1 %122  ;;  %v121_v43 = vpop.permute.xlu0 %120  ;;  %661 = vmatmul.mubr.msk.f32.vlgmr.msra.gmra.mrb[0].mxu1 %vm46_vm0, %v187_v37  ;;  %v411_v5 = vsel %vm408_vm7, %v409_v63, %v410_v1  ;;  %v413_v9 = vsel %vm408_vm7, %v410_v1, %v412_v6 }
  0xb6   :  { %132 = vst.msk [vmem:[#allocation2 + $0x21] sm:$0xff] %vm128_vm4, %v123_v42  ;;  %131 = vst.msk [vmem:[#allocation2 + $0x19] sm:$0xff] %vm128_vm4, %v121_v43  ;;  %666 = vmatmul.mubr.msk.f32.gmra.mrb[2].mxu0 %vm46_vm0, %v1016_v32  ;;  %292 = vmatprep.mubr.f32.mxu1 %v910_v0 }
  0xb7   :  { %726 = vmatpush1.bf16.msra.mxu1 %v707_v23  ;;  %712 = vmatpush1.bf16.msra.mxu0 %v711_v36 }
  0xb8   :  { %722 = vmatprep.subr.bf16.mxu1 %v709_v25  ;;  %714 = vmatprep.subr.bf16.mxu0 %v713_v39 }
  0xb9   :  { %v144_v51 = vpop.permute.xlu1 %143  ;;  %v142_v52 = vpop.permute.xlu0 %141  ;;  %662 = vmatmul.mubr.msk.f32.gmra.mrb[2].mxu1 %vm46_vm0, %v189_v47  ;;  %395 = vmatprep.mubr.f32.mxu0 %v910_v0 }
  0xba   :  { %153 = vst.msk [vmem:[#allocation2 + $0x21] sm:$0xff] %vm149_vm5, %v144_v51  ;;  %152 = vst.msk [vmem:[#allocation2 + $0x19] sm:$0xff] %vm149_vm5, %v142_v52  ;;  %298 = vmatprep.mubr.f32.mxu1 %v910_v0 }
  0xbb   :  { %727 = vmatpush1.bf16.msra.mxu1 %v711_v36  ;;  %716 = vmatpush1.bf16.msra.mxu0 %v715_v46 }
  0xbc   :  { %723 = vmatprep.subr.bf16.mxu1 %v713_v39  ;;  %718 = vmatprep.subr.bf16.mxu0 %v717_v48 }
  0xbf   :  { %728 = vmatpush1.bf16.msra.mxu1 %v715_v46  ;;  %720 = vmatpush1.bf16.msra.mxu0 %v719_v53 }
  0xc0   :  { %724 = vmatprep.subr.bf16.mxu1 %v717_v48  ;;  %462 = vmatprep.subr.mxu0 %v437_v54 }
  0xc1   :  { %v157_v56 = vld [vmem:[#allocation2 + $0x18] sm:$0xff]  ;;  %v158_v57 = vld [vmem:[#allocation2 + $0x20] sm:$0xff]  ;;  %v159_v58 = vld [vmem:[#allocation2 + $0x28] sm:$0x3] }
  0xc2   :  { %v190_v59 = vrot.slane %v157_v56, 1  ;;  %667 = vmatmul.mubr.msk.f32.gmra.mrb[4].mxu0 %vm46_vm0, %v157_v56  ;;  %v191_v60 = vrot.slane %v158_v57, 1  ;;  %v193_v62 = vrot.slane %v159_v58, 1  ;;  %v414_v2 = vrot.slane %v157_v56, 2 }
  0xc3   :  { %401 = vmatprep.mubr.f32.mxu0 %v910_v0  ;;  %729 = vmatpush1.bf16.msra.mxu1 %v719_v53  ;;  %v415_v3 = vrot.slane %v158_v57, 2  ;;  %v417_v8 = vrot.slane %v159_v58, 2 }
  0xc4   :  { %v192_v61 = vsel %vm184_vm6, %v190_v59, %v191_v60  ;;  %463 = vmatpush1.msra.mxu0 %v436_v55  ;;  %725 = vmatprep.subr.mxu1 %v437_v54  ;;  %v194_v4 = vsel %vm184_vm6, %v191_v60, %v193_v62 }
  0xc5   :  { %663 = vmatmul.mubr.msk.f32.gmra.mrb[4].mxu1 %vm46_vm0, %v192_v61  ;;  %v416_v7 = vsel %vm408_vm7, %v414_v2, %v415_v3  ;;  %v418_v10 = vsel %vm408_vm7, %v415_v3, %v417_v8 }
  0xc6   :  { %668 = vmatmul.mubr.msk.f32.gmra.mrb[6].mxu0 %vm46_vm0, %v158_v57  ;;  %304 = vmatprep.mubr.f32.mxu1 %v910_v0 }
  0xc7   :  { %510 = vmatprep.mubr.f32.mxu0 %v910_v0  ;;  %730 = vmatpush1.msra.mxu1 %v436_v55 }
  0xc9   :  { %664 = vmatmul.mubr.msk.f32.gmra.mrb[6].mxu1 %vm46_vm0, %v194_v4 }
  0xca   :  { %669 = vmatmul.mubr.msk.f32.vlgmr.msra.gmra.mrb[0].mxu0 %vm46_vm0, %v411_v5  ;;  %522 = vmatprep.mubr.f32.mxu1 %v910_v0 }
  0xcb   :  { %516 = vmatprep.mubr.f32.mxu0 %v910_v0 }
  0xcd   :  { %671 = vmatmul.mubr.msk.f32.vlgmr.msra.gmra.mrb[8].mxu1 %vm46_vm0, %v416_v7 }
  0xce   :  { %670 = vmatmul.mubr.msk.f32.gmra.mrb[2].mxu0 %vm46_vm0, %v413_v9  ;;  %528 = vmatprep.mubr.f32.mxu1 %v910_v0 }
  0xd1   :  { %672 = vmatmul.mubr.msk.f32.gmra.mrb[10].mxu1 %vm46_vm0, %v418_v10 }
 0x188   :  { %v288_v11 = vpop.f32.mrb[0].mxu1 }
 0x189   :  { %v290_v12 = vpop.f32.mrb[1].mxu1 }
 0x18c   :  { %v294_v13 = vpop.f32.mrb[2].mxu1 }
 0x18d   :  { %v296_v14 = vpop.f32.mrb[3].mxu1 }
 0x195   :  { %v397_v15 = vpop.f32.mrb[4].mxu0 }
 0x196   :  { %v399_v16 = vpop.f32.mrb[5].mxu0 }
 0x198   :  { %v300_v17 = vpop.f32.mrb[4].mxu1 }
 0x199   :  { %v398_v18 = vadd.f32 %v397_v15, %v300_v17  ;;  %v302_v19 = vpop.f32.mrb[5].mxu1  ;;  %v403_v20 = vpop.f32.mrb[6].mxu0 }
 0x19a   :  { %v400_v21 = vadd.f32 %v399_v16, %v302_v19  ;;  %v405_v22 = vpop.f32.mrb[7].mxu0 }
 0x19c   :  { %v306_v23 = vpop.f32.mrb[6].mxu1 }
 0x19d   :  { %v404_v24 = vadd.f32 %v403_v20, %v306_v23  ;;  %v308_v25 = vpop.f32.mrb[7].mxu1  ;;  %v512_v0 = vpop.f32.mrb[0].mxu0 }
 0x19e   :  { %v406_v26 = vadd.f32 %v405_v22, %v308_v25  ;;  %v731_v27 = vadd.f32 %v512_v0, %v288_v11  ;;  %v514_v28 = vpop.f32.mrb[1].mxu0 }
 0x19f   :  { %v732_v29 = vadd.f32 %v514_v28, %v290_v12 }
 0x1a0   :  { %592 = vst [vmem:[#allocation8] sm:$0xff] %v731_v27  ;;  %v524_v30 = vpop.f32.mrb[8].mxu1  ;;  %v552_v38 = vmul.f32 %v731_v27, %v731_v27 }
 0x1a1   :  { %596 = vst [vmem:[#allocation9] sm:$0xff] %v732_v29  ;;  %v539_v31 = vadd.f32 %v524_v30, %v398_v18  ;;  %v518_v32 = vpop.f32.mrb[2].mxu0  ;;  %v526_v33 = vpop.f32.mrb[9].mxu1  ;;  %v577_v42 = vmul.f32 %v732_v29, %v732_v29 }
 0x1a2   :  { %v733_v34 = vadd.f32 %v518_v32, %v294_v13  ;;  %v540_v35 = vadd.f32 %v526_v33, %v400_v21  ;;  %v520_v36 = vpop.f32.mrb[3].mxu0 }
 0x1a3   :  { %594 = vst [vmem:[#allocation8 + $0x10] sm:$0xff] %v539_v31  ;;  %v734_v37 = vadd.f32 %v520_v36, %v296_v14  ;;  %v554_v47 = vmul.f32 %v539_v31, %v539_v31 }
 0x1a4   :  { %v543_v39 = vadd.f32 %v733_v34, %v731_v27  ;;  %v553_v40 = vmul.f32 %v733_v34, %v733_v34  ;;  %593 = vst [vmem:[#allocation8 + $0x8] sm:$0xff] %v733_v34  ;;  %598 = vst [vmem:[#allocation9 + $0x10] sm:$0xff] %v540_v35  ;;  %v530_v41 = vpop.f32.mrb[10].mxu1  ;;  %v579_v51 = vmul.f32 %v540_v35, %v540_v35 }
 0x1a5   :  { %v568_v43 = vadd.f32 %v734_v37, %v732_v29  ;;  %v578_v44 = vmul.f32 %v734_v37, %v734_v37  ;;  %597 = vst [vmem:[#allocation9 + $0x8] sm:$0xff] %v734_v37  ;;  %v541_v45 = vadd.f32 %v530_v41, %v404_v24  ;;  %v532_v46 = vpop.f32.mrb[11].mxu1 }
 0x1a6   :  { %v556_v48 = vadd.f32 %v553_v40, %v552_v38  ;;  %v544_v49 = vadd.f32 %v543_v39, %v539_v31  ;;  %v542_v50 = vadd.f32 %v532_v46, %v406_v26 }
 0x1a7   :  { %v581_v52 = vadd.f32 %v578_v44, %v577_v42  ;;  %v555_v53 = vmul.f32 %v541_v45, %v541_v45  ;;  %595 = vst [vmem:[#allocation8 + $0x18] sm:$0xff] %v541_v45  ;;  %v569_v54 = vadd.f32 %v568_v43, %v540_v35 }
 0x1a8   :  { %v545_v55 = vadd.f32 %v544_v49, %v541_v45  ;;  %v557_v56 = vadd.f32 %v556_v48, %v554_v47  ;;  %v580_v57 = vmul.f32 %v542_v50, %v542_v50  ;;  %599 = vst [vmem:[#allocation9 + $0x18] sm:$0xff] %v542_v50 }
 0x1a9   :  { %817 = shalt.err (!%p814_p6)
}
 0x1aa   :  { %s818_s7 = scalar_lea.hbm %s1141_s2, 512 }
 0x1ab   :  { %p819_p7 = scmp.ne.s32.totalorder %s1141_s2, %s818_s7  ;;  %p822_p8 = scmp.lt.u32.totalorder %s818_s7, %s1141_s2 }
 0x1ad   :  { %p824_p9 = pnand %p822_p8, %p819_p7 }
 0x1af   :  { %827 = shalt.err (!%p824_p9)
}
 0x1b0   :  { %611 = dma.vmem_to_hbm [thread:$0]  %s1064_s24, 512, %s1141_s2, [#allocation5], %s905_s28, %s905_s28, %s906_s29   ;;  %v570_v58 = vadd.f32 %v569_v54, %v542_v50  ;;  %v582_v59 = vadd.f32 %v581_v52, %v579_v51 }
 0x1b1   :  { %s828_s14 = scalar_lea.vmem %s1066_s26, 512  ;;  %p833_p11 = scmp.lt.s32.totalorder %s1066_s26, %s1066_s26 }
 0x1b2   :  { %p829_p10 = scmp.ne.s32.totalorder %s1066_s26, %s828_s14  ;;  %p834_p12 = scmp.lt.s32.totalorder %s828_s14, %s828_s14 }
 0x1b4   :  { %p835_p13 = por %p834_p12, %p833_p11 }
 0x1b6   :  { %p836_p0 = pnand %p835_p13, %p829_p10 }
 0x1b8   :  { %839 = shalt.err (!%p836_p0)
}
 0x1b9   :  { %s840_s0 = scalar_lea.hbm %s1142_s3, 512 }
 0x1ba   :  { %p841_p1 = scmp.ne.s32.totalorder %s1142_s3, %s840_s0  ;;  %p844_p2 = scmp.lt.u32.totalorder %s840_s0, %s1142_s3 }
 0x1bc   :  { %p846_p3 = pnand %p844_p2, %p841_p1 }
 0x1be   :  { %849 = shalt.err (!%p846_p3)
}
 0x1bf   :  { %623 = dma.vmem_to_hbm [thread:$0]  %s1066_s26, 512, %s1142_s3, [#allocation10], %s905_s28, %s905_s28, %s906_s29   ;;  %v546_v60 = vrot.slane %v545_v55, 4  ;;  %v558_v61 = vadd.f32 %v557_v56, %v555_v53  ;;  %v571_v62 = vrot.slane %v570_v58, 4  ;;  %v583_v63 = vadd.f32 %v582_v59, %v580_v57 }
 0x1c0   :  { %s917_s3 = smov [#allocation11]   ;;  %vm565_vm8 = vcmask 1040384   ;;  %s918_s29 = smov [#allocation12]  }
 0x1c1   :  { %v547_v1 = vadd.f32 %v546_v60, %v545_v55  ;;  %v559_v2 = vrot.slane %v558_v61, 4  ;;  %v572_v3 = vadd.f32 %v571_v62, %v570_v58  ;;  %v584_v4 = vrot.slane %v583_v63, 4  ;;  %s630_s28 = sshll.u32 %s917_s3, 4  ;;  %s640_s21 = sshll.u32 %s918_s29, 4  ;;  %s631_s28 = int_to_ptr.vmem [resolvable:$true] %s630_s28  ;;  %s1108_s21 = int_to_ptr.vmem [resolvable:$true] %s640_s21 }
 0x1c2   :  { %s850_s22 = scalar_lea.vmem %s631_s28, 32  ;;  %p855_p5 = scmp.lt.s32.totalorder %s631_s28, %s631_s28 }
 0x1c3   :  { %v548_v5 = vrot.slane %v547_v1, 2  ;;  %v560_v6 = vadd.f32 %v559_v2, %v558_v61  ;;  %v573_v7 = vrot.slane %v572_v3, 2  ;;  %v585_v8 = vadd.f32 %v584_v4, %v583_v63  ;;  %p851_p4 = scmp.ne.s32.totalorder %s631_s28, %s850_s22  ;;  %p856_p6 = scmp.lt.s32.totalorder %s850_s22, %s850_s22 }
 0x1c5   :  { %v549_v9 = vadd.f32 %v548_v5, %v547_v1  ;;  %v561_v10 = vrot.slane %v560_v6, 2  ;;  %v574_v11 = vadd.f32 %v573_v7, %v572_v3  ;;  %v586_v12 = vrot.slane %v585_v8, 2  ;;  %p857_p7 = por %p856_p6, %p855_p5 }
 0x1c7   :  { %v550_v13 = vrot.slane %v549_v9, 1  ;;  %v562_v14 = vadd.f32 %v561_v10, %v560_v6  ;;  %v575_v15 = vrot.slane %v574_v11, 1  ;;  %v587_v16 = vadd.f32 %v586_v12, %v585_v8  ;;  %p858_p8 = pnand %p857_p7, %p851_p4 }
 0x1c9   :  { %v563_v17 = vrot.slane %v562_v14, 1  ;;  %v588_v18 = vrot.slane %v587_v16, 1  ;;  %v551_v19 = vadd.f32 %v550_v13, %v549_v9  ;;  %v576_v21 = vadd.f32 %v575_v15, %v574_v11 }
 0x1cb   :  { %v564_v20 = vadd.f32 %v563_v17, %v562_v14  ;;  %v589_v22 = vadd.f32 %v588_v18, %v587_v16 }
 0x1cd   :  { %v566_v23 = vsel %vm565_vm8, %v551_v19, %v564_v20  ;;  %v590_v24 = vsel %vm565_vm8, %v576_v21, %v589_v22 }
 0x1ce   :  { %567 = vst [vmem:[#allocation11] sm:$0x3] %v566_v23 }
 0x1cf   :  { %861 = shalt.err (!%p858_p8)
}
 0x1d0   :  { %s862_s25 = scalar_lea.hbm %s1143_s4, 32 }
 0x1d1   :  { %p863_p9 = scmp.ne.s32.totalorder %s1143_s4, %s862_s25  ;;  %p866_p10 = scmp.lt.u32.totalorder %s862_s25, %s1143_s4 }
 0x1d3   :  { %p868_p11 = pnand %p866_p10, %p863_p9 }
 0x1d5   :  { %871 = shalt.err (!%p868_p11)
}
 0x1d6   :  { %633 = dma.vmem_to_hbm [thread:$0]  %s631_s28, 32, %s1143_s4, [#allocation10]   ;;  %591 = vst [vmem:[#allocation12] sm:$0x3] %v590_v24 }
 0x1d7   :  { %s872_s9 = scalar_lea.vmem %s1108_s21, 32  ;;  %p877_p13 = scmp.lt.s32.totalorder %s1108_s21, %s1108_s21 }
 0x1d8   :  { %p873_p12 = scmp.ne.s32.totalorder %s1108_s21, %s872_s9  ;;  %p878_p0 = scmp.lt.s32.totalorder %s872_s9, %s872_s9 }
 0x1da   :  { %p879_p1 = por %p878_p0, %p877_p13 }
 0x1dc   :  { %p880_p2 = pnand %p879_p1, %p873_p12 }
 0x1de   :  { %883 = shalt.err (!%p880_p2)
}
 0x1df   :  { %s884_s12 = scalar_lea.hbm %s1144_s5, 32 }
 0x1e0   :  { %p885_p3 = scmp.ne.s32.totalorder %s1144_s5, %s884_s12  ;;  %p888_p4 = scmp.lt.u32.totalorder %s884_s12, %s1144_s5 }
 0x1e2   :  { %p890_p5 = pnand %p888_p4, %p885_p3 }
 0x1e4   :  { %893 = shalt.err (!%p890_p5)
}
 0x1e5   :  { %643 = dma.vmem_to_hbm [thread:$0]  %s1108_s21, 32, %s1144_s5, [#allocation13]  }
 0x1e6   :  { %898 = dma.done.wait [#allocation5], 512  }
 0x1e7   :  { %899 = vsyncadd [#allocation5], 4294966784 }
 0x1e8   :  { %900 = dma.done.wait [#allocation10], 544  }
 0x1e9   :  { %901 = vsyncadd [#allocation10], 4294966752 }
 0x1ea   :  { %902 = dma.done.wait [#allocation13], 32  }
 0x1eb   :  { %903 = vsyncadd [#allocation13], 4294967264 }
 0x1ec   :  { %656 = vsyncpa [#allocation4], 1 }
 0x1ed   :  { %657 = vsyncpa [#allocation7], 1 }
 0x1ee   :  { %658 = vsyncpa [#allocation5], 1 }
 0x1ef   :  { %659 = vsyncpa [#allocation10], 1 }
 0x1f0   :  { %660 = vsyncpa [#allocation13], 1 }

</bundles_post_ra>
